<compile_context>
chip_gen: v5e
topology: v5e:2x2
jax: 0.10.0
libtpu: 0.0.40
codegen_flags: <defaults>
</compile_context>

<pallas_src>
import jax
import jax.numpy as jnp
from jax.experimental import pallas as pl
from jax.experimental.pallas import tpu as pltpu


# ----------------------------------------------------------------------------
# Pallas kernel: fused geometry-feature (x, y, z) computation
# ----------------------------------------------------------------------------
def _geo_kernel(coef_ref, z_ref, v_ref, u_ref, o_ref):
    b = pl.program_id(0)
    a_v = coef_ref[4 * b + 0]
    b_v = coef_ref[4 * b + 1]
    a_u = coef_ref[4 * b + 2]
    b_u = coef_ref[4 * b + 3]

    z = z_ref[0]                                   # (t_rows, lanes)
    x = z * (v_ref[0] * a_v + b_v)
    y = z * (u_ref[0] * a_u + b_u)

    o_ref[0, 0] = x.astype(o_ref.dtype)
    o_ref[0, 1] = y.astype(o_ref.dtype)
    o_ref[0, 2] = z.astype(o_ref.dtype)


# ----------------------------------------------------------------------------
# Wrapper helpers
# ----------------------------------------------------------------------------
def _per_batch(val, batch):
    """Accept python scalar / () / [B] / [B,1,1,1] and return a [B] f32 vector."""
    v = jnp.asarray(val, jnp.float32).reshape(-1)
    if v.shape[0] == 1:
        v = jnp.broadcast_to(v, (batch,))
    return v


def _sublane_mult(itemsize):
    """Packed sublane multiple: 8 for 4-byte, 16 for 2-byte, 32 for 1-byte."""
    return max(8, 32 // max(1, itemsize))


def _vmem_budget(cap_bytes):
    """Per-input-block byte budget from the real ~12x per-step footprint
    (3 input planes + 3-plane output, each double buffered)."""
    total_target = min(cap_bytes // 2, 48 << 20)   # v7x: ~32 MiB; v5e/v6e: 48 MiB
    return max(1 << 20, total_target // 12)


def _vmem_capacity():
    try:
        return int(pltpu.get_tpu_info().vmem_capacity_bytes)
    except Exception:
        return 64 << 20                            # conservative (v7x per-TC VMEM)


def _choose_rows_tile(rows, lanes, itemsize, batch, per_input_budget):
    """Near-even row split, rounded to the packed sublane multiple, capped by
    the VMEM budget, with >=4 total grid steps when there is enough work."""
    sub = _sublane_mult(itemsize)
    max_rows = max(sub, (per_input_budget // (lanes * itemsize)) // sub * sub)

    # >= 4 evenly sized grid steps total (>= 2 per TensorCore on v7x megacore),
    # but only when the batch actually has enough rows to split.
    min_tiles = max(1, -(-4 // batch))             # ceil(4 / batch)
    if rows < min_tiles * sub:
        min_tiles = 1

    n_tiles = max(min_tiles, -(-rows // max_rows))  # ceil(rows / max_rows)
    t = -(-rows // n_tiles)                         # near-even split
    t = -(-t // sub) * sub                          # round up to sublane mult
    if t >= rows:
        return rows                                 # full extent: always legal
    return t


# ----------------------------------------------------------------------------
# Public wrapper
# ----------------------------------------------------------------------------
def geometry_feature(z, vnorm, unorm, h, w, ch, cw, fh, fw):
    """z, vnorm, unorm: [B, C, H, W] (NCHW).  Returns [B, 3*C, H, W]."""
    B, C, H, W = z.shape
    n = C * H * W
    itemsize = jnp.dtype(z.dtype).itemsize

    # --- choose a lane-dense flattening -------------------------------------
    if n % 128 == 0:
        lanes, pad = 128, 0
    elif W >= 128:
        lanes, pad = W, 0                           # wide W on the lane axis
    else:
        pad = (-n) % 128                            # one-time zero pad keeps
        lanes = 128                                 # every store lane-dense
    n_p = n + pad
    rows = n_p // lanes

    def _flatten(a):
        a = a.reshape(B, n)
        if pad:
            a = jnp.pad(a, ((0, 0), (0, pad)))
        return a.reshape(B, rows, lanes)

    z2, v2, u2 = _flatten(z), _flatten(vnorm), _flatten(unorm)

    # --- fold camera params into per-batch affine coefficients (SMEM) -------
    h_b = _per_batch(h, B) * 0.5
    w_b = _per_batch(w, B) * 0.5
    ch_b, cw_b = _per_batch(ch, B), _per_batch(cw, B)
    fh_b, fw_b = _per_batch(fh, B), _per_batch(fw, B)
    a_v = h_b / fh_b
    b_v = (h_b - ch_b) / fh_b
    a_u = w_b / fw_b
    b_u = (w_b - cw_b) / fw_b
    coef = jnp.stack([a_v, b_v, a_u, b_u], axis=1).reshape(-1)   # [4*B], f32

    # --- tile sizing against the real per-step VMEM footprint ---------------
    cap = _vmem_capacity()
    per_input_budget = _vmem_budget(cap)
    t_rows = _choose_rows_tile(rows, lanes, itemsize, B, per_input_budget)

    footprint = 12 * t_rows * lanes * itemsize      # 6 planes, double buffered
    vmem_limit = int(min(max(cap - (4 << 20), 16 << 20),
                         max(32 << 20, footprint + (8 << 20))))

    grid = (B, pl.cdiv(rows, t_rows))
    in_spec = pl.BlockSpec((1, t_rows, lanes), lambda b, i, coef: (b, i, 0))
    out_spec = pl.BlockSpec((1, 3, t_rows, lanes), lambda b, i, coef: (b, 0, i, 0))

    out = pl.pallas_call(
        _geo_kernel,
        out_shape=jax.ShapeDtypeStruct((B, 3, rows, lanes), z.dtype),
        grid_spec=pltpu.PrefetchScalarGridSpec(
            num_scalar_prefetch=1,
            grid=grid,
            in_specs=[in_spec, in_spec, in_spec],
            out_specs=out_spec,
        ),
        compiler_params=pltpu.CompilerParams(
            dimension_semantics=("parallel", "parallel"),
            vmem_limit_bytes=vmem_limit),
    )(coef, z2, v2, u2)

    # [B, 3, rows, lanes] -> strip pad -> [B, 3, C, H, W] -> [B, 3C, H, W]
    out = out.reshape(B, 3, n_p)
    if pad:
        out = out[:, :, :n]
    return out.reshape(B, 3, C, H, W).reshape(B, 3 * C, H, W)


# Pure-JAX reference (mirrors the PyTorch module exactly).
def geometry_feature_ref(z, vnorm, unorm, h, w, ch, cw, fh, fw):
    x = z * (0.5 * h * (vnorm + 1.0) - ch) / fh
    y = z * (0.5 * w * (unorm + 1.0) - cw) / fw
    return jnp.concatenate([x, y, z], axis=1)


# ----------------------------------------------------------------------------
if __name__ == "__main__":
    key = jax.random.PRNGKey(0)
    fwd = jax.jit(geometry_feature)

    def run_case(B, C, H, W, seed_keys):
        k1, k2, k3, k4, k5 = seed_keys
        z = jax.random.uniform(k1, (B, C, H, W), jnp.float32, 0.0, 10.0)
        vnorm = jnp.broadcast_to(
            jnp.linspace(-1.0, 1.0, H, dtype=jnp.float32)[None, None, :, None],
            (B, C, H, W))
        unorm = jnp.broadcast_to(
            jnp.linspace(-1.0, 1.0, W, dtype=jnp.float32)[None, None, None, :],
            (B, C, H, W))
        h, w = float(H) * 11.0, float(W) * 38.0
        fh = 721.5 + jax.random.uniform(k2, (B, 1, 1, 1), jnp.float32, -5.0, 5.0)
        fw = 721.5 + jax.random.uniform(k3, (B, 1, 1, 1), jnp.float32, -5.0, 5.0)
        ch = 172.85 + jax.random.uniform(k4, (B, 1, 1, 1), jnp.float32, -2.0, 2.0)
        cw = 609.5 + jax.random.uniform(k5, (B, 1, 1, 1), jnp.float32, -2.0, 2.0)

        out = fwd(z, vnorm, unorm, h, w, ch, cw, fh, fw)
        jax.block_until_ready(out)
        ref = geometry_feature_ref(z, vnorm, unorm, h, w, ch, cw, fh, fw)
        assert out.shape == (B, 3 * C, H, W)
        assert jnp.allclose(out, ref, atol=1e-4, rtol=1e-4), "mismatch vs reference"

    keys = jax.random.split(key, 10)
    run_case(2, 1, 32, 32, keys[:5])      # lane-dense main path (n % 128 == 0)
    run_case(2, 3, 17, 17, keys[5:])      # padded fallback path (n % 128 != 0)
    print("KERNEL_OK")
</pallas_src>

<mosaic_0001>
module attributes {stable_mosaic.version = 11 : i64} {
  func.func @_geo_kernel(%arg0: i32, %arg1: i32, %arg2: memref<8xf32, #tpu.memory_space<smem>>, %arg3: memref<1x8x128xf32, #tpu.memory_space<vmem>>, %arg4: memref<1x8x128xf32, #tpu.memory_space<vmem>>, %arg5: memref<1x8x128xf32, #tpu.memory_space<vmem>>, %arg6: memref<1x3x8x128xf32, #tpu.memory_space<vmem>>) attributes {dimension_semantics = [#tpu.dimension_semantics<parallel>, #tpu.dimension_semantics<parallel>], iteration_bounds = array<i64: 2, 1>, scalar_prefetch = 1 : i64, scratch_operands = 0 : i64, tpu.core_type = #tpu.core_type<tc>, window_params = [{transform_indices = @transform_0, window_bounds = array<i64: 1, 8, 128>}, {transform_indices = @transform_1, window_bounds = array<i64: 1, 8, 128>}, {transform_indices = @transform_2, window_bounds = array<i64: 1, 8, 128>}, {transform_indices = @transform_3, window_bounds = array<i64: 1, 3, 8, 128>}]} {
    %c4_i32 = arith.constant 4 : i32
    %0 = arith.muli %c4_i32, %arg0 : i32
    %c0_i32 = arith.constant 0 : i32
    %1 = arith.addi %0, %c0_i32 : i32
    %2 = arith.index_cast %1 : i32 to index
    %3 = memref.load %arg2[%2] : memref<8xf32, #tpu.memory_space<smem>>
    %c4_i32_0 = arith.constant 4 : i32
    %4 = arith.muli %c4_i32_0, %arg0 : i32
    %c1_i32 = arith.constant 1 : i32
    %5 = arith.addi %4, %c1_i32 : i32
    %6 = arith.index_cast %5 : i32 to index
    %7 = memref.load %arg2[%6] : memref<8xf32, #tpu.memory_space<smem>>
    %c4_i32_1 = arith.constant 4 : i32
    %8 = arith.muli %c4_i32_1, %arg0 : i32
    %c2_i32 = arith.constant 2 : i32
    %9 = arith.addi %8, %c2_i32 : i32
    %10 = arith.index_cast %9 : i32 to index
    %11 = memref.load %arg2[%10] : memref<8xf32, #tpu.memory_space<smem>>
    %c4_i32_2 = arith.constant 4 : i32
    %12 = arith.muli %c4_i32_2, %arg0 : i32
    %c3_i32 = arith.constant 3 : i32
    %13 = arith.addi %12, %c3_i32 : i32
    %14 = arith.index_cast %13 : i32 to index
    %15 = memref.load %arg2[%14] : memref<8xf32, #tpu.memory_space<smem>>
    %c0 = arith.constant 0 : index
    %c0_3 = arith.constant 0 : index
    %c0_4 = arith.constant 0 : index
    %16 = vector.load %arg3[%c0, %c0_3, %c0_4] : memref<1x8x128xf32, #tpu.memory_space<vmem>>, vector<1x8x128xf32>
    %17 = vector.shape_cast %16 : vector<1x8x128xf32> to vector<8x128xf32>
    %c0_5 = arith.constant 0 : index
    %c0_6 = arith.constant 0 : index
    %c0_7 = arith.constant 0 : index
    %18 = vector.load %arg4[%c0_5, %c0_6, %c0_7] : memref<1x8x128xf32, #tpu.memory_space<vmem>>, vector<1x8x128xf32>
    %19 = vector.shape_cast %18 : vector<1x8x128xf32> to vector<8x128xf32>
    %20 = vector.broadcast %3 : f32 to vector<8x128xf32>
    %21 = arith.mulf %19, %20 : vector<8x128xf32>
    %22 = vector.broadcast %7 : f32 to vector<8x128xf32>
    %23 = arith.addf %21, %22 : vector<8x128xf32>
    %24 = arith.mulf %17, %23 : vector<8x128xf32>
    %c0_8 = arith.constant 0 : index
    %c0_9 = arith.constant 0 : index
    %c0_10 = arith.constant 0 : index
    %25 = vector.load %arg5[%c0_8, %c0_9, %c0_10] : memref<1x8x128xf32, #tpu.memory_space<vmem>>, vector<1x8x128xf32>
    %26 = vector.shape_cast %25 : vector<1x8x128xf32> to vector<8x128xf32>
    %27 = vector.broadcast %11 : f32 to vector<8x128xf32>
    %28 = arith.mulf %26, %27 : vector<8x128xf32>
    %29 = vector.broadcast %15 : f32 to vector<8x128xf32>
    %30 = arith.addf %28, %29 : vector<8x128xf32>
    %31 = arith.mulf %17, %30 : vector<8x128xf32>
    %c0_11 = arith.constant 0 : index
    %c0_12 = arith.constant 0 : index
    %c0_13 = arith.constant 0 : index
    %c0_14 = arith.constant 0 : index
    %32 = vector.load %arg6[%c0_11, %c0_12, %c0_13, %c0_14] : memref<1x3x8x128xf32, #tpu.memory_space<vmem>>, vector<1x1x8x128xf32>
    %33 = vector.shape_cast %32 : vector<1x1x8x128xf32> to vector<8x128xf32>
    %34 = vector.shape_cast %24 : vector<8x128xf32> to vector<1x1x8x128xf32>
    tpu.vector_store %arg6[%c0_11, %c0_12, %c0_13, %c0_14], %34 {strides = array<i32>} : memref<1x3x8x128xf32, #tpu.memory_space<vmem>>, vector<1x1x8x128xf32>,
    %c0_15 = arith.constant 0 : index
    %c1 = arith.constant 1 : index
    %c0_16 = arith.constant 0 : index
    %c0_17 = arith.constant 0 : index
    %35 = vector.load %arg6[%c0_15, %c1, %c0_16, %c0_17] : memref<1x3x8x128xf32, #tpu.memory_space<vmem>>, vector<1x1x8x128xf32>
    %36 = vector.shape_cast %35 : vector<1x1x8x128xf32> to vector<8x128xf32>
    %37 = vector.shape_cast %31 : vector<8x128xf32> to vector<1x1x8x128xf32>
    tpu.vector_store %arg6[%c0_15, %c1, %c0_16, %c0_17], %37 {strides = array<i32>} : memref<1x3x8x128xf32, #tpu.memory_space<vmem>>, vector<1x1x8x128xf32>,
    %c0_18 = arith.constant 0 : index
    %c2 = arith.constant 2 : index
    %c0_19 = arith.constant 0 : index
    %c0_20 = arith.constant 0 : index
    %38 = vector.load %arg6[%c0_18, %c2, %c0_19, %c0_20] : memref<1x3x8x128xf32, #tpu.memory_space<vmem>>, vector<1x1x8x128xf32>
    %39 = vector.shape_cast %38 : vector<1x1x8x128xf32> to vector<8x128xf32>
    %40 = vector.shape_cast %17 : vector<8x128xf32> to vector<1x1x8x128xf32>
    tpu.vector_store %arg6[%c0_18, %c2, %c0_19, %c0_20], %40 {strides = array<i32>} : memref<1x3x8x128xf32, #tpu.memory_space<vmem>>, vector<1x1x8x128xf32>,
    return
  }
  func.func @transform_0(%arg0: i32, %arg1: i32, %arg2: memref<8xf32, #tpu.memory_space<smem>>) -> (i32, i32, i32) {
    %c0_i32 = arith.constant 0 : i32
    %c0_i32_0 = arith.constant 0 : i32
    return %arg0, %arg1, %c0_i32 : i32, i32, i32
  }
  func.func @transform_1(%arg0: i32, %arg1: i32, %arg2: memref<8xf32, #tpu.memory_space<smem>>) -> (i32, i32, i32) {
    %c0_i32 = arith.constant 0 : i32
    %c0_i32_0 = arith.constant 0 : i32
    return %arg0, %arg1, %c0_i32 : i32, i32, i32
  }
  func.func @transform_2(%arg0: i32, %arg1: i32, %arg2: memref<8xf32, #tpu.memory_space<smem>>) -> (i32, i32, i32) {
    %c0_i32 = arith.constant 0 : i32
    %c0_i32_0 = arith.constant 0 : i32
    return %arg0, %arg1, %c0_i32 : i32, i32, i32
  }
  func.func @transform_3(%arg0: i32, %arg1: i32, %arg2: memref<8xf32, #tpu.memory_space<smem>>) -> (i32, i32, i32, i32) {
    %c0_i32 = arith.constant 0 : i32
    %c0_i32_0 = arith.constant 0 : i32
    %c0_i32_1 = arith.constant 0 : i32
    return %arg0, %c0_i32, %arg1, %c0_i32_0 : i32, i32, i32, i32
  }
}

</mosaic_0001>

<bundles_post_ra>
// kernel: geometry_feature.1
= control target key start
LH: loop header
LB: loop body
LE: loop exit
PB: predicated region body
PF: predicated region fallthrough
CT: control target
= control target key end

     0   :  { %s478_s18 = smov [#allocation3]   ;;  %s546_s0 = inlined_call_operand.vmem [shape: f32[8], index: 0, kind: input, shape index: {}]   ;;  %s547_s1 = inlined_call_operand.vmem [shape: f32[2,8,128], index: 1, kind: input, shape index: {}]   ;;  %s548_s2 = inlined_call_operand.vmem [shape: f32[2,8,128], index: 2, kind: input, shape index: {}]   ;;  %s549_s3 = inlined_call_operand.vmem [shape: f32[2,8,128], index: 3, kind: input, shape index: {}]   ;;  %s550_s4 = inlined_call_operand.vmem [shape: f32[2,3,8,128], index: 4, kind: output, shape index: {}]  }
   0x1   :  { %s10_s17 = sshll.u32 %s546_s0, 4  ;;  %s11_s17 = int_to_ptr.vmem [resolvable:$true] %s10_s17 }
   0x2   :  { %13 = dma.vmem_to_smem %s11_s17, 16, %s478_s18, [#allocation2] }
   0x3   :  { %464 = dma.done.wait [#allocation2], 16 }
   0x4   :  { %465 = vsyncadd [#allocation2], 4294967280 }
   0x5   :  { %16 = sfence }
   0x6   :  { %s507_s19 = smov 0   ;;  %s509_s20 = smov 0  }
   0x7   :  { %s511_s21 = smov 0  }
   0x8 LB: > { %s34_s0 = sadd.s32 1, %s472_s20  ;;  %p404_p0 = scmp.ge.s32.totalorder %s476_s21, 1  ;;  %s476_s21 = sphi %s511_s21, %s22_s21   ;;  %s472_s20 = sphi %s509_s20, %s552_s20   ;;  %s468_s19 = sphi %s507_s19, %s551_s19  }
   0x9   : > { %p36_p1 = scmp.ge.s32.totalorder %s34_s0, 2  ;;  %p192_p2 = scmp.lt.s32.totalorder %s476_s21, 3 }
   0xb   : > { %s554_s0 = smov (%p36_p1, %s34_s0), 0  ;;  %p193_p3 = pnand %p404_p0, %p192_p2 }
   0xc   : > { %p235_p4 = scmp.lt.s32.totalorder (!%p193_p3), %s468_s19, 1  ;;  %s409_s22 = sshll.u32 (!%p193_p3), %s468_s19, 2 }
   0xd   : > { %196 = sbr.rel (%p193_p3) target bundleno = 31 (0x1f), region = 32  ;;  %s265_s23 = sld [smem:[#allocation3 + %s409_s22]] (!%p193_p3) }
   0xe   : > { %s266_s24 = sadd.s32 (!%p193_p3), 1, %s409_s22  ;;  %s268_s26 = sadd.s32 (!%p193_p3), 2, %s409_s22 }
   0xf   : > { %s267_s25 = sld [smem:[#allocation3 + %s266_s24]] (!%p193_p3)  ;;  %s270_s13 = sadd.s32 (!%p193_p3), 3, %s409_s22 }
  0x10   : > { %s269_s12 = sld [smem:[#allocation3 + %s268_s26]] (!%p193_p3) }
  0x11   : > { %s271_s17 = sld [smem:[#allocation3 + %s270_s13]] (!%p193_p3) }
  0x12   : > { %s556_s19 = smov (!%p235_p4, %s468_s19), 1 }
  0x13   : > { %s405_s27 = sshll.u32 %s556_s19, 3  ;;  %s414_s28 = smul.u32 24, %s556_s19  ;;  %v274_v2 = vstv %s265_s23 }
  0x14   : > { %s241_s5 = scalar_lea.vmem %s547_s1, %s405_s27  ;;  %s248_s8 = scalar_lea.vmem %s548_s2, %s405_s27 }
  0x15   : > { %s263_s11 = scalar_lea.vmem %s550_s4, %s414_s28  ;;  %v272_v0 = vld [vmem:[%s241_s5] sm:$0xff]  ;;  %s255_s16 = scalar_lea.vmem %s549_s3, %s405_s27  ;;  %v276_v4 = vstv %s267_s25 }
  0x16   : > { %v273_v1 = vld [vmem:[%s248_s8] sm:$0xff]  ;;  %411 = vst [vmem:[%s263_s11 + $0x10] sm:$0xff] %v272_v0  ;;  %v280_v8 = vstv %s269_s12 }
  0x17   : > { %v275_v3 = vmul.f32 %v274_v2, %v273_v1  ;;  %v279_v6 = vld [vmem:[%s255_s16] sm:$0xff]  ;;  %v282_v10 = vstv %s271_s17 }
  0x18   : > { %v281_v9 = vmul.f32 %v280_v8, %v279_v6 }
  0x19   : > { %v277_v5 = vadd.f32 %v276_v4, %v275_v3 }
  0x1a   : > { %v283_v11 = vadd.f32 %v282_v10, %v281_v9 }
  0x1b   : > { %v278_v7 = vmul.f32 %v277_v5, %v272_v0 }
  0x1c   : > { %v284_v12 = vmul.f32 %v283_v11, %v272_v0 }
  0x1d   : > { %285 = vst [vmem:[%s263_s11] sm:$0xff] %v278_v7 }
  0x1e   : > { %410 = vst [vmem:[%s263_s11 + $0x8] sm:$0xff] %v284_v12 }
  0x1f PF: > { %s22_s21 = sadd.s32 1, %s476_s21   ;;  %s551_s19 = smov %s472_s20 }
  0x20   : > { %p19_p5 = scmp.ge.s32.totalorder %s22_s21, 4   ;;  %s552_s20 = smov %s554_s0 }
  0x22   :  { %21 = sbr.rel (!%p19_p5) target bundleno = 8 (0x8), region = 70 }

</bundles_post_ra>
